<compile_context>
chip_gen: v5e
topology: v5e:2x2
jax: 0.10.0
libtpu: 0.0.40
codegen_flags: <defaults>
</compile_context>

<pallas_src>
import jax
import jax.numpy as jnp
from jax import lax
from jax.experimental import pallas as pl
from jax.experimental.pallas import tpu as pltpu

LN_EPS = 1e-5  # PyTorch nn.LayerNorm default


def _round_up(x, m):
    return ((x + m - 1) // m) * m


def _make_kernel(h_real):
    """Fused linear + tanh + LayerNorm kernel for a given (real) hidden dim."""
    inv_h = 1.0 / float(h_real)

    def kernel(x_ref, w_ref, p_ref, o_ref):
        # x: (bm, Fp) bf16, w: (Fp, Hp) bf16, p: (3, Hp) f32 = [bias; gamma; beta].
        bias = p_ref[0:1, :]
        gamma = p_ref[1:2, :]
        beta = p_ref[2:3, :]

        # MXU matmul, f32 accumulation, then f32 epilogue.
        h = jnp.dot(x_ref[...], w_ref[...],
                    preferred_element_type=jnp.float32) + bias
        h = jnp.tanh(h)  # EUP

        # One-pass LayerNorm stats.  Padded H columns are exactly 0 (zero
        # weights + zero bias -> tanh(0) == 0), so the sums only see the real
        # H columns; divide by the real H, not the padded width.
        s = jnp.sum(h, axis=-1, keepdims=True)
        ss = jnp.sum(h * h, axis=-1, keepdims=True)
        mean = s * inv_h
        var = jnp.maximum(ss * inv_h - mean * mean, 0.0)
        normed = (h - mean) * lax.rsqrt(var + LN_EPS)  # EUP rsqrt

        # Affine; padded columns have gamma == beta == 0 -> output 0 there.
        out = normed * gamma + beta

        # Dropout: identity in eval mode.
        # TODO(synk): training-mode dropout would use pltpu.prng_seed /
        # pltpu.prng_random_bits + a keep-mask scale.
        o_ref[...] = out.astype(o_ref.dtype)

    return kernel


def nplm_first_block(inputs, emb_table, w, b, gamma, beta, *, bm=128):
    """inputs: (B, W) int32 token ids.  w: (W*E, H) (transposed PyTorch Linear)."""
    B, W = inputs.shape
    V, E = emb_table.shape
    F = W * E
    H = w.shape[1]

    # Glue: embedding gather + flatten, kept in bf16 so the HBM intermediate
    # (and the kernel's x DMA) is half-width.
    x = jnp.take(emb_table.astype(jnp.bfloat16), inputs, axis=0).reshape(B, F)

    # Pad feature dims to the 128-lane width (lane-dense loads/stores, aligned
    # MXU K and N).  Zero padding does not change the matmul result.
    Fp = _round_up(F, 128)
    Hp = _round_up(H, 128)

    # Batch tiling: pad B to a multiple of the tile so every block is full.
    Bp = _round_up(B, 8)
    bm_eff = min(bm, Bp)
    Bp = _round_up(Bp, bm_eff)

    x = jnp.pad(x, ((0, Bp - B), (0, Fp - F)))
    wp = jnp.pad(w.astype(jnp.bfloat16), ((0, Fp - F), (0, Hp - H)))

    # Pack bias / ln-gamma / ln-beta into one (3, Hp) f32 operand.
    params = jnp.stack([
        jnp.pad(b.astype(jnp.float32), (0, Hp - H)),
        jnp.pad(gamma.astype(jnp.float32), (0, Hp - H)),
        jnp.pad(beta.astype(jnp.float32), (0, Hp - H)),
    ], axis=0)

    grid = (Bp // bm_eff,)

    # Rough double-buffered VMEM budget; clamp to a safe range so the scoped
    # default (16/32 MiB) never rejects a larger tile.
    vmem_bytes = (2 * bm_eff * Fp * 2      # x tile (bf16), double-buffered
                  + 2 * Fp * Hp * 2        # weight (bf16)
                  + 2 * 8 * Hp * 4         # packed params (padded to 8 sublanes)
                  + 2 * bm_eff * Hp * 4    # output tile (f32)
                  + (2 << 20))             # headroom
    vmem_bytes = int(min(max(vmem_bytes, 16 << 20), 64 << 20))

    out = pl.pallas_call(
        _make_kernel(H),
        out_shape=jax.ShapeDtypeStruct((Bp, Hp), jnp.float32),
        grid_spec=pltpu.PrefetchScalarGridSpec(
            num_scalar_prefetch=0,
            grid=grid,
            in_specs=[
                pl.BlockSpec((bm_eff, Fp), lambda i: (i, 0)),  # x tile
                pl.BlockSpec((Fp, Hp), lambda i: (0, 0)),      # full weight
                pl.BlockSpec((3, Hp), lambda i: (0, 0)),       # bias/gamma/beta
            ],
            out_specs=pl.BlockSpec((bm_eff, Hp), lambda i: (i, 0)),
        ),
        compiler_params=pltpu.CompilerParams(
            dimension_semantics=("parallel",),
            vmem_limit_bytes=vmem_bytes),
    )(x, wp, params)

    # Strip batch / hidden padding.
    return out[:B, :H]


def reference(inputs, emb_table, w, b, gamma, beta):
    """Pure-JAX f32 reference matching PyTorch eval-mode forward."""
    B = inputs.shape[0]
    x = jnp.take(emb_table, inputs, axis=0).reshape(B, -1).astype(jnp.float32)
    h = jnp.tanh(x @ w + b)
    mean = jnp.mean(h, axis=-1, keepdims=True)
    var = jnp.mean((h - mean) ** 2, axis=-1, keepdims=True)
    return (h - mean) / jnp.sqrt(var + LN_EPS) * gamma + beta


if __name__ == "__main__":
    # Module hyperparameters (small, consistent with the forward pass); batch
    # sized so the kernel grid has multiple "parallel" steps (v7x megacore).
    vocab_size = 50
    embed_dim = 8
    local_window_size = 4
    hidden_dim = 32
    batch = 256

    key = jax.random.PRNGKey(0)
    k_emb, k_w, k_b, k_in = jax.random.split(key, 4)

    emb_table = jax.random.normal(k_emb, (vocab_size, embed_dim), jnp.float32)
    fan_in = local_window_size * embed_dim
    bound = 1.0 / jnp.sqrt(fan_in)
    # stored as (in_features, hidden) — transposed from PyTorch's Linear weight
    w = jax.random.uniform(k_w, (fan_in, hidden_dim), jnp.float32, -bound, bound)
    b = jax.random.uniform(k_b, (hidden_dim,), jnp.float32, -bound, bound)
    gamma = jnp.ones((hidden_dim,), jnp.float32)   # LayerNorm weight init
    beta = jnp.zeros((hidden_dim,), jnp.float32)   # LayerNorm bias init

    inputs = jax.random.randint(k_in, (batch, local_window_size), 0, vocab_size,
                                dtype=jnp.int32)

    out = nplm_first_block(inputs, emb_table, w, b, gamma, beta, bm=128)
    out = jax.block_until_ready(out)

    ref = reference(inputs, emb_table, w, b, gamma, beta)
    assert out.shape == (batch, hidden_dim)
    # Tolerance loosened because the matmul operands are bf16 (f32 accumulate).
    assert jnp.allclose(out, ref, atol=5e-2, rtol=5e-2), "mismatch vs reference"

    print("KERNEL_OK")
</pallas_src>

<mosaic_0001>
module attributes {stable_mosaic.version = 11 : i64} {
  func.func @kernel(%arg0: i32, %arg1: memref<128x128xbf16, #tpu.memory_space<vmem>>, %arg2: memref<128x128xbf16, #tpu.memory_space<vmem>>, %arg3: memref<3x128xf32, #tpu.memory_space<vmem>>, %arg4: memref<128x128xf32, #tpu.memory_space<vmem>>) attributes {dimension_semantics = [#tpu.dimension_semantics<parallel>], iteration_bounds = array<i64: 2>, scalar_prefetch = 0 : i64, scratch_operands = 0 : i64, tpu.core_type = #tpu.core_type<tc>, window_params = [{transform_indices = @transform_0, window_bounds = array<i64: 128, 128>}, {pipeline_mode = #tpu.pipeline_mode<synchronous>, transform_indices = @transform_1, window_bounds = array<i64: 128, 128>}, {pipeline_mode = #tpu.pipeline_mode<synchronous>, transform_indices = @transform_2, window_bounds = array<i64: 3, 128>}, {transform_indices = @transform_3, window_bounds = array<i64: 128, 128>}]} {
    %c0 = arith.constant 0 : index
    %c0_0 = arith.constant 0 : index
    %0 = vector.load %arg3[%c0, %c0_0] : memref<3x128xf32, #tpu.memory_space<vmem>>, vector<1x128xf32>
    %c1 = arith.constant 1 : index
    %c0_1 = arith.constant 0 : index
    %1 = vector.load %arg3[%c1, %c0_1] : memref<3x128xf32, #tpu.memory_space<vmem>>, vector<1x128xf32>
    %c2 = arith.constant 2 : index
    %c0_2 = arith.constant 0 : index
    %2 = vector.load %arg3[%c2, %c0_2] : memref<3x128xf32, #tpu.memory_space<vmem>>, vector<1x128xf32>
    %c0_3 = arith.constant 0 : index
    %c0_4 = arith.constant 0 : index
    %3 = vector.load %arg1[%c0_3, %c0_4] : memref<128x128xbf16, #tpu.memory_space<vmem>>, vector<128x128xbf16>
    %c0_5 = arith.constant 0 : index
    %c0_6 = arith.constant 0 : index
    %4 = vector.load %arg2[%c0_5, %c0_6] : memref<128x128xbf16, #tpu.memory_space<vmem>>, vector<128x128xbf16>
    %cst = arith.constant dense<0.000000e+00> : vector<128x128xf32>
    %5 = tpu.matmul %3, %4, %cst {dimension_numbers = #tpu.dot_dimension_numbers<[1], [0], [0], [1], [0, 0, 1, 1], [], []>} : vector<128x128xbf16>, vector<128x128xbf16>, vector<128x128xf32> -> vector<128x128xf32>
    %6 = vector.broadcast %0 : vector<1x128xf32> to vector<128x128xf32>
    %7 = arith.addf %5, %6 : vector<128x128xf32>
    %8 = math.tanh %7 : vector<128x128xf32>
    %cst_7 = arith.constant dense<0.000000e+00> : vector<128xf32>
    %9 = vector.multi_reduction <add>, %8, %cst_7 [1] : vector<128x128xf32> to vector<128xf32>
    %10 = vector.shape_cast %9 : vector<128xf32> to vector<128x1xf32>
    %11 = arith.mulf %8, %8 : vector<128x128xf32>
    %cst_8 = arith.constant dense<0.000000e+00> : vector<128xf32>
    %12 = vector.multi_reduction <add>, %11, %cst_8 [1] : vector<128x128xf32> to vector<128xf32>
    %13 = vector.shape_cast %12 : vector<128xf32> to vector<128x1xf32>
    %cst_9 = arith.constant 3.125000e-02 : f32
    %14 = vector.broadcast %cst_9 : f32 to vector<128x1xf32>
    %15 = arith.mulf %10, %14 : vector<128x1xf32>
    %cst_10 = arith.constant 3.125000e-02 : f32
    %16 = vector.broadcast %cst_10 : f32 to vector<128x1xf32>
    %17 = arith.mulf %13, %16 : vector<128x1xf32>
    %18 = arith.mulf %15, %15 : vector<128x1xf32>
    %19 = arith.subf %17, %18 : vector<128x1xf32>
    %cst_11 = arith.constant 0.000000e+00 : f32
    %20 = vector.broadcast %cst_11 : f32 to vector<128x1xf32>
    %21 = arith.maximumf %19, %20 : vector<128x1xf32>
    %22 = vector.broadcast %15 : vector<128x1xf32> to vector<128x128xf32>
    %23 = arith.subf %8, %22 : vector<128x128xf32>
    %cst_12 = arith.constant 9.99999974E-6 : f32
    %24 = vector.broadcast %cst_12 : f32 to vector<128x1xf32>
    %25 = arith.addf %21, %24 : vector<128x1xf32>
    %26 = math.rsqrt %25 : vector<128x1xf32>
    %27 = vector.broadcast %26 : vector<128x1xf32> to vector<128x128xf32>
    %28 = arith.mulf %23, %27 : vector<128x128xf32>
    %29 = vector.broadcast %1 : vector<1x128xf32> to vector<128x128xf32>
    %30 = arith.mulf %28, %29 : vector<128x128xf32>
    %31 = vector.broadcast %2 : vector<1x128xf32> to vector<128x128xf32>
    %32 = arith.addf %30, %31 : vector<128x128xf32>
    %c0_13 = arith.constant 0 : index
    %c0_14 = arith.constant 0 : index
    %33 = vector.load %arg4[%c0_13, %c0_14] : memref<128x128xf32, #tpu.memory_space<vmem>>, vector<128x128xf32>
    tpu.vector_store %arg4[%c0_13, %c0_14], %32 {strides = array<i32>} : memref<128x128xf32, #tpu.memory_space<vmem>>, vector<128x128xf32>,
    return
  }
  func.func @transform_0(%arg0: i32) -> (i32, i32) {
    %c0_i32 = arith.constant 0 : i32
    %c0_i32_0 = arith.constant 0 : i32
    return %arg0, %c0_i32 : i32, i32
  }
  func.func @transform_1(%arg0: i32) -> (i32, i32) {
    %c0_i32 = arith.constant 0 : i32
    %c0_i32_0 = arith.constant 0 : i32
    %c0_i32_1 = arith.constant 0 : i32
    return %c0_i32, %c0_i32_0 : i32, i32
  }
  func.func @transform_2(%arg0: i32) -> (i32, i32) {
    %c0_i32 = arith.constant 0 : i32
    %c0_i32_0 = arith.constant 0 : i32
    %c0_i32_1 = arith.constant 0 : i32
    return %c0_i32, %c0_i32_0 : i32, i32
  }
  func.func @transform_3(%arg0: i32) -> (i32, i32) {
    %c0_i32 = arith.constant 0 : i32
    %c0_i32_0 = arith.constant 0 : i32
    return %arg0, %c0_i32 : i32, i32
  }
}

</mosaic_0001>

<bundles_post_ra>
// kernel: tpu_custom_call.1
= control target key start
LH: loop header
LB: loop body
LE: loop exit
PB: predicated region body
PF: predicated region fallthrough
CT: control target
= control target key end

     0   :  { %8 = vsyncpa [#allocation3], 0  ;;  %s1887_s0 = inlined_call_operand.hbm [shape: bf16[256,128], index: 0, kind: input, shape index: {}]   ;;  %s1888_s1 = inlined_call_operand.hbm [shape: bf16[128,128], index: 1, kind: input, shape index: {}]   ;;  %s1889_s2 = inlined_call_operand.hbm [shape: f32[3,128], index: 2, kind: input, shape index: {}]   ;;  %s1890_s3 = inlined_call_operand.hbm [shape: f32[256,128], index: 3, kind: output, shape index: {}]  }
   0x1   :  { %10 = vsyncpa [#allocation3 + $0x1], 0 }
   0x2   :  { %11 = vsyncpa [#allocation6], 0 }
   0x3   :  { %12 = vsyncpa [#allocation4], 0 }
   0x4   :  { %14 = vsyncpa [#allocation4 + $0x1], 0  ;;  %s1397_s12 = smov 0   ;;  %s1399_s13 = smov 0  }
   0x5   :  { %s1401_s14 = smov 0   ;;  %s1403_s15 = smov 0  }
   0x6 LB: > { %s1418_s16 = sadd.s32 4294967295, %s1369_s15   ;;  %s947_s17 = sadd.s32 4294967294, %s1369_s15   ;;  %s1369_s15 = sphi %s1403_s15, %s1900_s15   ;;  %s1365_s14 = sphi %s1401_s14, %s1899_s14   ;;  %s1361_s13 = sphi %s1399_s13, %s1898_s13   ;;  %s1357_s12 = sphi %s1397_s12, %s1897_s12  }
   0x7   : > { %p40_p0 = scmp.ne.s32.totalorder %s1361_s13, %s1357_s12  ;;  %p41_p1 = scmp.eq.s32.totalorder %s1418_s16, 0 }
   0x8   : > { %p106_p2 = scmp.eq.s32.totalorder %s1418_s16, 1  ;;  %p112_p3 = scmp.eq.s32.totalorder %s947_s17, 1 }
   0x9   : > { %p1427_p4 = por %p41_p1, %p40_p0  ;;  %p948_p5 = scmp.ge.s32.totalorder %s1369_s15, 1 }
   0xa   : > { %p1432_p6 = por %p112_p3, %p40_p0  ;;  %p119_p7 = scmp.lt.s32.totalorder %s1369_s15, 3 }
   0xb   : > { %s130_s22 = sshll.u32 %s1888_s1, 4  ;;  %s1371_s24 = smov [#allocation5]   ;;  %s131_s22 = int_to_ptr.hbm [resolvable:$true] %s130_s22 }
   0xc   : > { %p1440_p8 = pnand %p948_p5, %p119_p7  ;;  %s132_s25 = sshll.u32 %s1371_s24, 4  ;;  %s133_s25 = int_to_ptr.vmem [resolvable:$true] %s132_s25 }
   0xd   : > { %s145_s28 = sshll.u32 %s1889_s2, 4  ;;  %s1372_s29 = smov 64   ;;  %s146_s28 = int_to_ptr.hbm [resolvable:$true] %s145_s28 }
   0xe   : > { %p1083_p9 = pneg %p1440_p8  ;;  %s1373_s30 = smov 4  }
   0xf   : > { %s1374_s4 = smov [#allocation7]   ;;  %s1456_s6 = sadd.s32 1, %s1369_s15  }
  0x10   : > { %p1084_p10 = pnand %p1083_p9, %p41_p1  ;;  %s147_s5 = sshll.u32 %s1374_s4, 4  ;;  %s148_s5 = int_to_ptr.vmem [resolvable:$true] %s147_s5 }
  0x11   : > { %s27_s7 = sadd.s32 1, %s1365_s14  ;;  %s24_s8 = ssub.s32 %s1369_s15, %s1456_s6 }
  0x12   : > { %1086 = dma.hbm_to_vmem [thread:$0]  (!%p1084_p10), %s131_s22, 1024, %s133_s25, [#allocation6], %s1372_s29, %s1372_s29, %s1373_s30  }
  0x13   : > { %1089 = dma.hbm_to_vmem [thread:$0]  (!%p1084_p10), %s146_s28, 64, %s148_s5, [#allocation6]  }
  0x14   : > { %p34_p12 = scmp.ne.s32.totalorder %s1365_s14, %s1361_s13  ;;  %p25_p13 = scmp.eq.s32.totalorder %s24_s8, 0 }
  0x15   : > { %p35_p0 = scmp.eq.s32.totalorder %s1369_s15, 0  ;;  %p1100_p5 = scmp.lt.s32.totalorder %s1369_s15, 2 }
  0x16   : > { %p1466_p3 = por %p106_p2, %p34_p12  ;;  %s158_s11 = sand.u32 1, %s1365_s14  }
  0x17   : > { %s1472_s10 = scalar_select %p25_p13, %s1365_s14, %s27_s7  }
  0x18   : > { %p36_p7 = por %p35_p0, %p34_p12  ;;  %s952_s17 = sshll.u32 %s158_s11, 6 }
  0x19   : > { %s1029_s20 = sshll.u32 %s1369_s15, 6  ;;  %s162_s25 = scalar_lea.vmem [#allocation2], %s952_s17 }
  0x1a   : > { %s167_s24 = scalar_lea.hbm %s1887_s0, %s1029_s20  ;;  %s170_s26 = sshll.u32 %s162_s25, 4  ;;  %s171_s26 = int_to_ptr.vmem [resolvable:$true] %s170_s26 }
  0x1b   : > { %s168_s27 = sshll.u32 %s167_s24, 4  ;;  %p1479_p2 = pnand %p1100_p5, %p36_p7  ;;  %s169_s27 = int_to_ptr.hbm [resolvable:$true] %s168_s27 }
  0x1c   : > { %s159_s4 = scalar_lea.sflag [#allocation3], %s158_s11  ;;  %s1269_s5 = sshra.s32 %s169_s27, 4  ;;  %s1270_s5 = int_to_ptr.hbm [resolvable:$true] %s1269_s5 }
  0x1d   : > { %s1271_s7 = scalar_lea.hbm %s1270_s5, 64  ;;  %p1273_p10 = pneg %p1479_p2 }
  0x1e   : > { %p1272_p9 = scmp.ne.s32.totalorder %s1270_s5, %s1271_s7  ;;  %s1276_s20 = scalar_lea.hbm %s1887_s0, 128 }
  0x1f   : > { %p1277_p0 = scmp.lt.s32.totalorder %s1270_s5, %s1887_s0  ;;  %p1278_p5 = scmp.lt.s32.totalorder %s1276_s20, %s1271_s7 }
  0x20   : > { %p1274_p12 = pnand %p1273_p10, %p1272_p9 }
  0x21   : > { %p1279_p7 = por %p1278_p5, %p1277_p0 }
  0x22   : > { %p1275_p13 = pneg %p1274_p12 }
  0x24   : > { %p1280_p11 = pnand %p1279_p7, %p1275_p13 }
  0x26   : > { %1283 = shalt.err (!%p1280_p11)
}
  0x27   : > { %1093 = dma.hbm_to_vmem [thread:$0]  (!%p1479_p2), %s169_s27, 1024, %s171_s26, %s159_s4, %s1372_s29, %s1372_s29, %s1373_s30  }
  0x28   : > { %182 = sbr.rel (%p1440_p8) target bundleno = 450 (0x1c2), region = 32  ;;  %s1499_s11 = sand.u32 (!%p1440_p8), 1, %s1361_s13  }
  0x29   : > { %s956_s24 = sshll.u32 (!%p1440_p8), %s1499_s11, 6  ;;  %s185_s25 = scalar_lea.sflag (!%p1440_p8), [#allocation3], %s1499_s11 }
  0x2a   : > { %s1503_s5 = scalar_lea.vmem (!%p1440_p8), [#allocation2], %s956_s24 }
  0x2d   : > { %1344 = dma.done.wait (%p1427_p4), %s185_s25, 1024  }
  0x2e   : > { %1346 = vsyncadd (%p1427_p4), %s185_s25, 4294966272 }
  0x2f   : > { %1348 = dma.done.wait (%p41_p1), [#allocation6], 1088  }
  0x30   : > { %1350 = vsyncadd (%p41_p1), [#allocation6], 4294966208  ;;  %v1045_v0 = vld [vmem:[#allocation5 + $0x38] sm:$0xff]  ;;  %v1044_v1 = vld [vmem:[#allocation5 + $0x30] sm:$0xff]  ;;  %s959_s18 = sshll.u32 %s1499_s11, 7  ;;  %s1046_s29 = sshll.u32 %s1418_s16, 7 }
  0x31   : > { %356 = vmatpush.bf16.msra.mxu0 %v1045_v0  ;;  %1047 = vmatpush.bf16.msra.mxu1 %v1045_v0  ;;  %v1043_v2 = vld [vmem:[#allocation5 + $0x28] sm:$0xff]  ;;  %v1042_v3 = vld [vmem:[#allocation5 + $0x20] sm:$0xff]  ;;  %v1041_v4 = vld [vmem:[#allocation5 + $0x18] sm:$0xff]  ;;  %s1653_s23 = scalar_lea.vmem [#allocation8], %s959_s18  ;;  %s851_s27 = scalar_lea.hbm %s1890_s3, %s1046_s29 }
  0x32   : > { %1049 = vmatpush.bf16.msra.mxu3 %v1045_v0  ;;  %1048 = vmatpush.bf16.msra.mxu2 %v1045_v0  ;;  %v1040_v5 = vld [vmem:[#allocation5 + $0x10] sm:$0xff]  ;;  %v1039_v6 = vld [vmem:[#allocation5 + $0x8] sm:$0xff]  ;;  %v1038_v7 = vld [vmem:[#allocation5] sm:$0xff]  ;;  %s852_s16 = sshll.u32 %s1653_s23, 4  ;;  %s854_s28 = sshll.u32 %s851_s27, 4  ;;  %s853_s16 = int_to_ptr.vmem [resolvable:$true] %s852_s16  ;;  %s855_s28 = int_to_ptr.hbm [resolvable:$true] %s854_s28 }
  0x33   : > { %v1030_v8 = vld [vmem:[%s1503_s5] sm:$0xff]  ;;  %v1032_v9 = vld [vmem:[%s1503_s5 + $0x10] sm:$0xff]  ;;  %v1031_v12 = vld [vmem:[%s1503_s5 + $0x8] sm:$0xff]  ;;  %s840_s4 = scalar_lea.sflag [#allocation4], %s1499_s11  ;;  %s1313_s7 = sshra.s32 %s855_s28, 4  ;;  %s1314_s7 = int_to_ptr.hbm [resolvable:$true] %s1313_s7 }
  0x34   : > { %v1036_v10 = vld [vmem:[%s1503_s5 + $0x30] sm:$0xff]  ;;  %v1034_v11 = vld [vmem:[%s1503_s5 + $0x20] sm:$0xff]  ;;  %v1033_v13 = vld [vmem:[%s1503_s5 + $0x18] sm:$0xff]  ;;  %s1315_s8 = scalar_lea.hbm %s1314_s7, 128  ;;  %s1319_s21 = scalar_lea.hbm %s1890_s3, 256 }
  0x35   : > { %357 = vmatpush.bf16.msra.mxu0 %v1044_v1  ;;  %1050 = vmatpush.bf16.msra.mxu1 %v1044_v1  ;;  %v1037_v14 = vld [vmem:[%s1503_s5 + $0x38] sm:$0xff]  ;;  %v1035_v15 = vld [vmem:[%s1503_s5 + $0x28] sm:$0xff]  ;;  %v1521_v16 = vld [vmem:[#allocation7] ss:$0 sm:$0xff]  ;;  %p1316_p1 = scmp.ne.s32.totalorder %s1314_s7, %s1315_s8  ;;  %p1320_p11 = scmp.lt.s32.totalorder %s1314_s7, %s1890_s3 }
  0x36   : > { %1052 = vmatpush.bf16.msra.mxu3 %v1044_v1  ;;  %1051 = vmatpush.bf16.msra.mxu2 %v1044_v1  ;;  %p1321_p2 = scmp.lt.s32.totalorder %s1319_s21, %s1315_s8 }
  0x37   : > { %p1317_p4 = pnand %p1316_p1, %p1466_p3 }
  0x38   : > { %p1322_p9 = por %p1321_p2, %p1320_p11 }
  0x39   : > { %358 = vmatpush.bf16.msra.mxu0 %v1043_v2  ;;  %1053 = vmatpush.bf16.msra.mxu1 %v1043_v2  ;;  %p1318_p8 = pneg %p1317_p4 }
  0x3a   : > { %1055 = vmatpush.bf16.msra.mxu3 %v1043_v2  ;;  %1054 = vmatpush.bf16.msra.mxu2 %v1043_v2 }
  0x3b   : > { %p1323_p10 = pnand %p1322_p9, %p1318_p8 }
  0x3d   : > { %359 = vmatpush.bf16.msra.mxu0 %v1042_v3  ;;  %1056 = vmatpush.bf16.msra.mxu1 %v1042_v3 }
  0x3e   : > { %1058 = vmatpush.bf16.msra.mxu3 %v1042_v3  ;;  %1057 = vmatpush.bf16.msra.mxu2 %v1042_v3 }
  0x41   : > { %360 = vmatpush.bf16.msra.mxu0 %v1041_v4  ;;  %1059 = vmatpush.bf16.msra.mxu1 %v1041_v4 }
  0x42   : > { %1061 = vmatpush.bf16.msra.mxu3 %v1041_v4  ;;  %1060 = vmatpush.bf16.msra.mxu2 %v1041_v4 }
  0x45   : > { %361 = vmatpush.bf16.msra.mxu0 %v1040_v5  ;;  %1062 = vmatpush.bf16.msra.mxu1 %v1040_v5 }
  0x46   : > { %1064 = vmatpush.bf16.msra.mxu3 %v1040_v5  ;;  %1063 = vmatpush.bf16.msra.mxu2 %v1040_v5 }
  0x49   : > { %362 = vmatpush.bf16.msra.mxu0 %v1039_v6  ;;  %1065 = vmatpush.bf16.msra.mxu1 %v1039_v6 }
  0x4a   : > { %1067 = vmatpush.bf16.msra.mxu3 %v1039_v6  ;;  %1066 = vmatpush.bf16.msra.mxu2 %v1039_v6 }
  0x4d   : > { %363 = vmatpush.bf16.msra.mxu0 %v1038_v7  ;;  %1068 = vmatpush.bf16.msra.mxu1 %v1038_v7 }
  0x4e   : > { %1070 = vmatpush.bf16.msra.mxu3 %v1038_v7  ;;  %1069 = vmatpush.bf16.msra.mxu2 %v1038_v7 }
  0x50   : > { %364 = vmatmul.bf16.vlgmr.msra.gmra.mxu0 %v1030_v8  ;;  %374 = vmatmul.bf16.vlgmr.msra.gmra.mxu1 %v1032_v9 }
  0x51   : > { %394 = vmatmul.bf16.vlgmr.msra.gmra.mxu3 %v1036_v10  ;;  %384 = vmatmul.bf16.vlgmr.msra.gmra.mxu2 %v1034_v11 }
  0x60   : > { %369 = vmatmul.bf16.gmra.mxu0 %v1031_v12  ;;  %379 = vmatmul.bf16.gmra.mxu1 %v1033_v13 }
  0x61   : > { %399 = vmatmul.bf16.gmra.mxu3 %v1037_v14  ;;  %389 = vmatmul.bf16.gmra.mxu2 %v1035_v15 }
  0xcd   : > { %v365_v17 = vpop.f32.mrf.mxu0  ;;  %v375_v18 = vpop.f32.mrf.mxu1 }
  0xce   : > { %v366_v19 = vadd.f32 %v1521_v16, %v365_v17  ;;  %v376_v20 = vadd.f32 %v1521_v16, %v375_v18 }
  0xd0   : > { %1145 = vtanh.f32 %v366_v19 }
  0xd1   : > { %1147 = vtanh.f32 %v376_v20 }
  0xd4   : > { %v395_v21 = vpop.f32.mrf.mxu3  ;;  %v385_v26 = vpop.f32.mrf.mxu2 }
  0xd5   : > { %v396_v22 = vadd.f32 %v1521_v16, %v395_v21  ;;  %v367_v27 = vpop.f32.mrf.mxu0  ;;  %v386_v28 = vadd.f32 %v1521_v16, %v385_v26  ;;  %v377_v35 = vpop.f32.mrf.mxu1 }
  0xd6   : > { %v1526_v23 = vpop.eup %1145  ;;  %v368_v29 = vadd.f32 %v1521_v16, %v367_v27  ;;  %v378_v39 = vadd.f32 %v1521_v16, %v377_v35 }
  0xd7   : > { %v1528_v24 = vpop.eup %1147  ;;  %1149 = vtanh.f32 %v396_v22  ;;  %421 = vadd.xlane.f32.xlu0 %v1526_v23  ;;  %v453_v25 = vmul.f32 %v1526_v23, %v1526_v23 }
  0xd8   : > { %429 = vadd.xlane.f32.xlu2 %v1528_v24  ;;  %v457_v31 = vmul.f32 %v1528_v24, %v1528_v24  ;;  %1151 = vtanh.f32 %v386_v28 }
  0xd9   : > { %469 = vadd.xlane.f32.xlu1 %v453_v25  ;;  %1153 = vtanh.f32 %v368_v29 }
  0xdc   : > { %v397_v30 = vpop.f32.mrf.mxu3  ;;  %v387_v41 = vpop.f32.mrf.mxu2 }
  0xdd   : > { %v1538_v32 = vpop.eup %1149  ;;  %v398_v33 = vadd.f32 %v1521_v16, %v397_v30  ;;  %v370_v36 = vpop.f32.mrf.mxu0  ;;  %v388_v43 = vadd.f32 %v1521_v16, %v387_v41 }
  0xde   : > { %v465_v34 = vmul.f32 %v1538_v32, %v1538_v32  ;;  %v371_v37 = vadd.f32 %v1521_v16, %v370_v36  ;;  %v1545_v38 = vpop.eup %1151  ;;  %v380_v47 = vpop.f32.mrf.mxu1 }
  0xdf   : > { %445 = vadd.xlane.f32.xlu0 %v1538_v32  ;;  %1155 = vtanh.f32 %v398_v33  ;;  %v1548_v40 = vpop.eup %1153  ;;  %v461_v44 = vmul.f32 %v1545_v38, %v1545_v38  ;;  %v381_v48 = vadd.f32 %v1521_v16, %v380_v47 }
  0xe0   : > { %477 = vadd.xlane.f32.xlu2 %v457_v31  ;;  %1157 = vtanh.f32 %v371_v37  ;;  %v454_v54 = vmul.f32 %v1548_v40, %v1548_v40 }
  0xe1   : > { %493 = vadd.xlane.f32.xlu1 %v465_v34  ;;  %1159 = vtanh.f32 %v378_v39 }
  0xe2   : > { %1161 = vtanh.f32 %v388_v43 }
  0xe3   : > { %1163 = vtanh.f32 %v381_v48 }
  0xe4   : > { %v400_v49 = vpop.f32.mrf.mxu3  ;;  %v390_v53 = vpop.f32.mrf.mxu2 }
  0xe5   : > { %v1551_v42 = vpop.eup %1155  ;;  %v401_v50 = vadd.f32 %v1521_v16, %v400_v49  ;;  %v391_v55 = vadd.f32 %v1521_v16, %v390_v53  ;;  %v372_v63 = vpop.f32.mrf.mxu0 }
  0xe6   : > { %v1558_v45 = vpop.eup %1157  ;;  %v382_v60 = vpop.f32.mrf.mxu1  ;;  %v373_v1 = vadd.f32 %v1521_v16, %v372_v63  ;;  %v466_v13 = vmul.f32 %v1551_v42, %v1551_v42 }
  0xe7   : > { %423 = vadd.xlane.f32.xlu0 %v1548_v40  ;;  %v1560_v46 = vpop.eup %1159  ;;  %1165 = vtanh.f32 %v401_v50  ;;  %v383_v62 = vadd.f32 %v1521_v16, %v382_v60  ;;  %v455_v7 = vmul.f32 %v1558_v45, %v1558_v45 }
  0xe8   : > { %437 = vadd.xlane.f32.xlu2 %v1545_v38  ;;  %v1566_v51 = vpop.eup %1161  ;;  %v458_v52 = vmul.f32 %v1560_v46, %v1560_v46  ;;  %1167 = vtanh.f32 %v391_v55 }
  0xe9   : > { %447 = vadd.xlane.f32.xlu1 %v1551_v42  ;;  %v462_v56 = vmul.f32 %v1566_v51, %v1566_v51  ;;  %v1575_v57 = vpop.eup %1163  ;;  %1169 = vtanh.f32 %v383_v62 }
  0xea   : > { %v459_v59 = vmul.f32 %v1575_v57, %v1575_v57  ;;  %1171 = vtanh.f32 %v373_v1 }
  0xec   : > { %v402_v2 = vpop.f32.mrf.mxu3  ;;  %v392_v3 = vpop.f32.mrf.mxu2 }
  0xed   : > { %v1577_v58 = vpop.eup %1165  ;;  %v403_v5 = vadd.f32 %v1521_v16, %v402_v2  ;;  %v393_v6 = vadd.f32 %v1521_v16, %v392_v3 }
  0xee   : > { %v1583_v61 = vpop.eup %1167  ;;  %v467_v15 = vmul.f32 %v1577_v58, %v1577_v58 }
  0xef   : > { %485 = vadd.xlane.f32.xlu0 %v461_v44  ;;  %v463_v0 = vmul.f32 %v1583_v61, %v1583_v61  ;;  %v1591_v4 = vpop.eup %1169  ;;  %1173 = vtanh.f32 %v403_v5 }
  0xf0   : > { %431 = vadd.xlane.f32.xlu2 %v1560_v46  ;;  %v460_v8 = vmul.f32 %v1591_v4, %v1591_v4  ;;  %v1599_v9 = vpop.eup %1171  ;;  %1175 = vtanh.f32 %v393_v6 }
  0xf1   : > { %425 = vadd.xlane.f32.xlu1 %v1558_v45  ;;  %v456_v14 = vmul.f32 %v1599_v9, %v1599_v9 }
  0xf5   : > { %v1602_v10 = vpop.eup %1173 }
  0xf6   : > { %v1604_v11 = vpop.eup %1175  ;;  %v468_v16 = vmul.f32 %v1602_v10, %v1602_v10 }
  0xf7   : > { %479 = vadd.xlane.f32.xlu0 %v458_v52  ;;  %v464_v12 = vmul.f32 %v1604_v11, %v1604_v11 }
  0xf8   : > { %471 = vadd.xlane.f32.xlu2 %v454_v54 }
  0xf9   : > { %487 = vadd.xlane.f32.xlu1 %v462_v56 }
  0xff   : > { %439 = vadd.xlane.f32.xlu0 %v1566_v51 }
 0x100   : > { %449 = vadd.xlane.f32.xlu2 %v1577_v58 }
 0x101   : > { %481 = vadd.xlane.f32.xlu1 %v459_v59 }
 0x107   : > { %433 = vadd.xlane.f32.xlu0 %v1575_v57 }
 0x108   : > { %489 = vadd.xlane.f32.xlu2 %v463_v0 }
 0x109   : > { %441 = vadd.xlane.f32.xlu1 %v1583_v61 }
 0x10f   : > { %473 = vadd.xlane.f32.xlu0 %v455_v7 }
 0x110   : > { %483 = vadd.xlane.f32.xlu2 %v460_v8 }
 0x111   : > { %427 = vadd.xlane.f32.xlu1 %v1599_v9 }
 0x117   : > { %451 = vadd.xlane.f32.xlu0 %v1602_v10 }
 0x118   : > { %443 = vadd.xlane.f32.xlu2 %v1604_v11 }
 0x119   : > { %435 = vadd.xlane.f32.xlu1 %v1591_v4 }
 0x11f   : > { %491 = vadd.xlane.f32.xlu0 %v464_v12  ;;  %v1636_v12 = vld [vmem:[#allocation7 + $0x1] ss:$0 sm:$0xff] }
 0x120   : > { %495 = vadd.xlane.f32.xlu2 %v466_v13 }
 0x121   : > { %475 = vadd.xlane.f32.xlu1 %v456_v14 }
 0x127   : > { %497 = vadd.xlane.f32.xlu0 %v467_v15 }
 0x129   : > { %499 = vadd.xlane.f32.xlu1 %v468_v16 }
 0x14a   : > { %v422_v17 = vpop.xlane.xlu0 %421 }
 0x14b   : > { %v430_v18 = vpop.xlane.xlu2 %429  ;;  %v501_v19 = vmul.f32 0.03125, %v422_v17 }
 0x14c   : > { %v470_v20 = vpop.xlane.xlu1 %469  ;;  %v1619_v26 = vmul.f32 0.03125, %v430_v18  ;;  %v1641_v18 = vld [vmem:[#allocation7 + $0x2] ss:$0 sm:$0xff] }
 0x14d   : > { %v533_v21 = vmul.f32 %v501_v19, %v501_v19  ;;  %v517_v22 = vmul.f32 0.03125, %v470_v20  ;;  %v581_v8 = vsub.f32 %v1526_v23, %v501_v19 }
 0x14e   : > { %v537_v28 = vmul.f32 %v1619_v26, %v1619_v26 }
 0x14f   : > { %v549_v25 = vsub.f32 %v517_v22, %v533_v21 }
 0x151   : > { %v565_v27 = vmax.f32 %v549_v25, 0.0 }
 0x152   : > { %v446_v29 = vpop.xlane.xlu0 %445 }
 0x153   : > { %v597_v30 = vadd.f32 1e-05, %v565_v27  ;;  %v478_v31 = vpop.xlane.xlu2 %477  ;;  %v1623_v33 = vmul.f32 0.03125, %v446_v29  ;;  %v585_v29 = vsub.f32 %v1528_v24, %v1619_v26 }
 0x154   : > { %v521_v34 = vmul.f32 0.03125, %v478_v31  ;;  %v494_v35 = vpop.xlane.xlu1 %493 }
 0x155   : > { %1177 = vrsqrt.f32 %v597_v30  ;;  %v545_v36 = vmul.f32 %v1623_v33, %v1623_v33  ;;  %v529_v39 = vmul.f32 0.03125, %v494_v35  ;;  %vm619_vm1 = vweird.f32 %v597_v30 }
 0x156   : > { %v553_v37 = vsub.f32 %v521_v34, %v537_v28 }
 0x157   : > { %v561_v43 = vsub.f32 %v529_v39, %v545_v36 }
 0x158   : > { %v569_v41 = vmax.f32 %v553_v37, 0.0 }
 0x159   : > { %v577_v47 = vmax.f32 %v561_v43, 0.0 }
 0x15a   : > { %v601_v44 = vadd.f32 1e-05, %v569_v41  ;;  %v424_v48 = vpop.xlane.xlu0 %423 }
 0x15b   : > { %v1178_v49 = vpop.eup %1177  ;;  %v438_v50 = vpop.xlane.xlu2 %437  ;;  %v609_v54 = vadd.f32 1e-05, %v577_v47  ;;  %v1638_v17 = vmul.f32 0.03125, %v424_v48 }
 0x15c   : > { %v614_v52 = vmul.f32 %v1178_v49, %v597_v30  ;;  %1179 = vrsqrt.f32 %v601_v44  ;;  %v1627_v53 = vpop.xlane.xlu1 %447  ;;  %v1629_v56 = vmul.f32 0.03125, %v438_v50  ;;  %vm620_vm0 = vweird.f32 %v1178_v49 }
 0x15d   : > { %1181 = vrsqrt.f32 %v609_v54  ;;  %vm621_vm2 = vmor %vm619_vm1, %vm620_vm0  ;;  %vm659_vm4 = vweird.f32 %v601_v44  ;;  %v534_v31 = vmul.f32 %v1638_v17, %v1638_v17  ;;  %vm739_vm7 = vweird.f32 %v609_v54 }
 0x15e   : > { %v615_v55 = vmul.f32 %v1178_v49, %v614_v52  ;;  %v541_v60 = vmul.f32 %v1629_v56, %v1629_v56  ;;  %v593_v52 = vsub.f32 %v1538_v32, %v1623_v33 }
 0x160   : > { %v616_v59 = vmul.f32 0.5, %v615_v55 }
 0x162   : > { %v1180_v62 = vpop.eup %1179  ;;  %v617_v63 = vsub.f32 1.5, %v616_v59  ;;  %v486_v0 = vpop.xlane.xlu0 %485 }
 0x163   : > { %v654_v1 = vmul.f32 %v1180_v62, %v601_v44  ;;  %v432_v2 = vpop.xlane.xlu2 %431  ;;  %v525_v3 = vmul.f32 0.03125, %v486_v0  ;;  %v1182_v7 = vpop.eup %1181  ;;  %vm660_vm3 = vweird.f32 %v1180_v62 }
 0x164   : > { %v618_v5 = vmul.f32 %v1178_v49, %v617_v63  ;;  %v1633_v6 = vpop.xlane.xlu1 %425  ;;  %v734_v16 = vmul.f32 %v1182_v7, %v609_v54  ;;  %v1643_v27 = vmul.f32 0.03125, %v432_v2  ;;  %vm740_vm5 = vweird.f32 %v1182_v7  ;;  %vm661_vm6 = vmor %vm659_vm4, %vm660_vm3 }
 0x165   : > { %v655_v13 = vmul.f32 %v1180_v62, %v654_v1  ;;  %v557_v14 = vsub.f32 %v525_v3, %v541_v60  ;;  %vm741_vm8 = vmor %vm739_vm7, %vm740_vm5 }
 0x166   : > { %v622_v15 = vsel %vm621_vm2, %v1178_v49, %v618_v5  ;;  %v735_v25 = vmul.f32 %v1182_v7, %v734_v16  ;;  %v538_v41 = vmul.f32 %v1643_v27, %v1643_v27 }
 0x167   : > { %v773_v20 = vmul.f32 %v622_v15, %v581_v8  ;;  %v656_v21 = vmul.f32 0.5, %v655_v13  ;;  %v573_v22 = vmax.f32 %v557_v14, 0.0 }
 0x168   : > { %v736_v30 = vmul.f32 0.5, %v735_v25 }
 0x169   : > { %v790_v23 = vmul.f32 %v1636_v12, %v773_v20  ;;  %v657_v19 = vsub.f32 1.5, %v656_v21  ;;  %v605_v28 = vadd.f32 1e-05, %v573_v22 }
 0x16a   : > { %v480_v34 = vpop.xlane.xlu0 %479  ;;  %v737_v39 = vsub.f32 1.5, %v736_v30 }
 0x16b   : > { %v807_v35 = vadd.f32 %v1641_v18, %v790_v23  ;;  %v658_v36 = vmul.f32 %v1180_v62, %v657_v19  ;;  %1183 = vrsqrt.f32 %v605_v28  ;;  %v472_v37 = vpop.xlane.xlu2 %471  ;;  %v522_v47 = vmul.f32 0.03125, %v480_v34 }
 0x16c   : > { %v518_v43 = vmul.f32 0.03125, %v472_v37  ;;  %v488_v24 = vpop.xlane.xlu1 %487  ;;  %v738_v48 = vmul.f32 %v1182_v7, %v737_v39  ;;  %vm699_vm10 = vweird.f32 %v605_v28 }
 0x16d   : > { %823 = vst [vmem:[%s1653_s23] sm:$0xff] %v807_v35  ;;  %v662_v26 = vsel %vm661_vm6, %v1180_v62, %v658_v36  ;;  %v554_v50 = vsub.f32 %v522_v47, %v538_v41  ;;  %v526_v15 = vmul.f32 0.03125, %v488_v24 }
 0x16e   : > { %v777_v44 = vmul.f32 %v662_v26, %v585_v29  ;;  %v550_v49 = vsub.f32 %v518_v43, %v534_v31  ;;  %v742_v59 = vsel %vm741_vm8, %v1182_v7, %v738_v48  ;;  %v589_v31 = vsub.f32 %v1545_v38, %v1629_v56 }
 0x16f   : > { %v570_v63 = vmax.f32 %v554_v50, 0.0  ;;  %v785_v1 = vmul.f32 %v742_v59, %v593_v52 }
 0x170   : > { %v794_v55 = vmul.f32 %v1636_v12, %v777_v44  ;;  %v566_v60 = vmax.f32 %v550_v49, 0.0  ;;  %v1692_v49 = vmul.f32 0.03125, %v1633_v6 }
 0x171   : > { %v1184_v0 = vpop.eup %1183  ;;  %v802_v5 = vmul.f32 %v1636_v12, %v785_v1  ;;  %v1664_v32 = vadd.f32 1e-05, %v570_v63 }
 0x172   : > { %v811_v62 = vadd.f32 %v1641_v18, %v794_v55  ;;  %v694_v54 = vmul.f32 %v1184_v0, %v605_v28  ;;  %v1661_v2 = vadd.f32 1e-05, %v566_v60  ;;  %v440_v3 = vpop.xlane.xlu0 %439  ;;  %vm700_vm9 = vweird.f32 %v1184_v0 }
 0x173   : > { %v1666_v33 = vpop.xlane.xlu2 %449  ;;  %v1668_v8 = vmul.f32 0.03125, %v440_v3  ;;  %v819_v14 = vadd.f32 %v1641_v18, %v802_v5  ;;  %vm701_vm11 = vmor %vm699_vm10, %vm700_vm9  ;;  %v582_v60 = vsub.f32 %v1548_v40, %v1638_v17  ;;  %v535_v5 = vmul.f32 %v1692_v49, %v1692_v49 }
 0x174   : > { %827 = vst [vmem:[%s1653_s23 + $0x20] sm:$0xff] %v811_v62  ;;  %v695_v7 = vmul.f32 %v1184_v0, %v694_v54  ;;  %1185 = vrsqrt.f32 %v1661_v2  ;;  %v482_v13 = vpop.xlane.xlu1 %481  ;;  %vm629_vm14 = vweird.f32 %v1661_v2  ;;  %vm669_vm0 = vweird.f32 %v1664_v32 }
 0x175   : > { %1187 = vrsqrt.f32 %v1664_v32  ;;  %v542_v16 = vmul.f32 %v1668_v8, %v1668_v8  ;;  %835 = vst [vmem:[%s1653_s23 + $0x60] sm:$0xff] %v819_v14  ;;  %v523_v28 = vmul.f32 0.03125, %v482_v13 }
 0x176   : > { %v696_v20 = vmul.f32 0.5, %v695_v7 }
 0x177   : > { %v558_v21 = vsub.f32 %v526_v15, %v542_v16 }
 0x178   : > { %v697_v22 = vsub.f32 1.5, %v696_v20  ;;  %v586_v20 = vsub.f32 %v1560_v46, %v1643_v27 }
 0x179   : > { %v574_v25 = vmax.f32 %v558_v21, 0.0 }
 0x17a   : > { %v1186_v23 = vpop.eup %1185  ;;  %v698_v19 = vmul.f32 %v1184_v0, %v697_v22  ;;  %v434_v29 = vpop.xlane.xlu0 %433 }
 0x17b   : > { %v1188_v30 = vpop.eup %1187  ;;  %v624_v34 = vmul.f32 %v1186_v23, %v1661_v2  ;;  %v1680_v35 = vadd.f32 1e-05, %v574_v25  ;;  %v490_v36 = vpop.xlane.xlu2 %489  ;;  %v1682_v37 = vmul.f32 0.03125, %v434_v29  ;;  %vm630_vm12 = vweird.f32 %v1186_v23 }
 0x17c   : > { %v702_v39 = vsel %vm701_vm11, %v1184_v0, %v698_v19  ;;  %v664_v41 = vmul.f32 %v1188_v30, %v1664_v32  ;;  %v442_v43 = vpop.xlane.xlu1 %441  ;;  %v527_v44 = vmul.f32 0.03125, %v490_v36  ;;  %vm670_vm13 = vweird.f32 %v1188_v30  ;;  %vm631_vm15 = vmor %vm629_vm14, %vm630_vm12 }
 0x17d   : > { %v781_v47 = vmul.f32 %v702_v39, %v589_v31  ;;  %v625_v24 = vmul.f32 %v1186_v23, %v624_v34  ;;  %1189 = vrsqrt.f32 %v1680_v35  ;;  %v539_v38 = vmul.f32 %v1682_v37, %v1682_v37  ;;  %vm671_vm1 = vmor %vm669_vm0, %vm670_vm13 }
 0x17e   : > { %v665_v26 = vmul.f32 %v1188_v30, %v664_v41  ;;  %v1688_v56 = vmul.f32 0.03125, %v442_v43  ;;  %v1714_v36 = vmul.f32 0.03125, %v1627_v53  ;;  %vm709_vm3 = vweird.f32 %v1680_v35 }
 0x17f   : > { %v798_v48 = vmul.f32 %v1636_v12, %v781_v47  ;;  %v626_v50 = vmul.f32 0.5, %v625_v24  ;;  %v555_v55 = vsub.f32 %v523_v28, %v539_v38  ;;  %v583_v38 = vsub.f32 %v1558_v45, %v1692_v49 }
 0x180   : > { %v666_v52 = vmul.f32 0.5, %v665_v26  ;;  %v543_v59 = vmul.f32 %v1688_v56, %v1688_v56  ;;  %v1728_v28 = vmul.f32 %v1714_v36, %v1714_v36 }
 0x181   : > { %v815_v63 = vadd.f32 %v1641_v18, %v798_v48  ;;  %v627_v0 = vsub.f32 1.5, %v626_v50  ;;  %v571_v62 = vmax.f32 %v555_v55, 0.0  ;;  %v590_v48 = vsub.f32 %v1566_v51, %v1668_v8 }
 0x182   : > { %v667_v1 = vsub.f32 1.5, %v666_v52  ;;  %v559_v54 = vsub.f32 %v527_v44, %v543_v59  ;;  %v474_v3 = vpop.xlane.xlu0 %473  ;;  %v1741_v55 = vmul.f32 0.03125, %v1666_v33  ;;  %v591_v51 = vsub.f32 %v1583_v61, %v1688_v56 }
 0x183   : > { %v1190_v6 = vpop.eup %1189  ;;  %831 = vst [vmem:[%s1653_s23 + $0x40] sm:$0xff] %v815_v63  ;;  %v628_v7 = vmul.f32 %v1186_v23, %v627_v0  ;;  %v484_v13 = vpop.xlane.xlu2 %483  ;;  %v519_v14 = vmul.f32 0.03125, %v474_v3  ;;  %v1705_v15 = vadd.f32 1e-05, %v571_v62 }
 0x184   : > { %v668_v40 = vmul.f32 %v1188_v30, %v667_v1  ;;  %v704_v17 = vmul.f32 %v1190_v6, %v1680_v35  ;;  %v428_v16 = vpop.xlane.xlu1 %427  ;;  %v575_v22 = vmax.f32 %v559_v54, 0.0  ;;  %vm710_vm2 = vweird.f32 %v1190_v6 }
 0x185   : > { %v632_v21 = vsel %vm631_vm15, %v1186_v23, %v628_v7  ;;  %v551_v25 = vsub.f32 %v519_v14, %v535_v5  ;;  %1191 = vrsqrt.f32 %v1705_v15  ;;  %vm711_vm4 = vmor %vm709_vm3, %vm710_vm2  ;;  %v1738_v52 = vmul.f32 0.03125, %v428_v16 }
 0x186   : > { %v774_v2 = vmul.f32 %v632_v21, %v582_v60  ;;  %v672_v19 = vsel %vm671_vm1, %v1188_v30, %v668_v40  ;;  %v705_v29 = vmul.f32 %v1190_v6, %v704_v17  ;;  %v1711_v32 = vadd.f32 1e-05, %v575_v22 }
 0x187   : > { %v778_v31 = vmul.f32 %v672_v19, %v586_v20  ;;  %v567_v34 = vmax.f32 %v551_v25, 0.0  ;;  %v587_v35 = vsub.f32 %v1575_v57, %v1682_v37  ;;  %vm679_vm5 = vweird.f32 %v1705_v15 }
 0x188   : > { %v791_v46 = vmul.f32 %v1636_v12, %v774_v2  ;;  %v706_v27 = vmul.f32 0.5, %v705_v29  ;;  %1193 = vrsqrt.f32 %v1711_v32  ;;  %v524_v33 = vmul.f32 0.03125, %v484_v13 }
 0x189   : > { %v795_v23 = vmul.f32 %v1636_v12, %v778_v31  ;;  %v1719_v30 = vadd.f32 1e-05, %v567_v34  ;;  %vm719_vm6 = vweird.f32 %v1711_v32 }
 0x18a   : > { %v808_v39 = vadd.f32 %v1641_v18, %v791_v46  ;;  %v707_v41 = vsub.f32 1.5, %v706_v27  ;;  %v1722_v43 = vpop.xlane.xlu0 %451 }
 0x18b   : > { %v812_v47 = vadd.f32 %v1641_v18, %v795_v23  ;;  %1195 = vrsqrt.f32 %v1719_v30  ;;  %v444_v53 = vpop.xlane.xlu2 %443  ;;  %v1192_v24 = vpop.eup %1191  ;;  %vm639_vm12 = vweird.f32 %v1719_v30 }
 0x18c   : > { %824 = vst [vmem:[%s1653_s23 + $0x8] sm:$0xff] %v808_v39  ;;  %v708_v26 = vmul.f32 %v1190_v6, %v707_v41  ;;  %v436_v44 = vpop.xlane.xlu1 %435  ;;  %v674_v50 = vmul.f32 %v1192_v24, %v1705_v15  ;;  %v1749_v8 = vmul.f32 0.03125, %v444_v53  ;;  %vm680_vm7 = vweird.f32 %v1192_v24 }
 0x18d   : > { %828 = vst [vmem:[%s1653_s23 + $0x28] sm:$0xff] %v812_v47  ;;  %v1745_v60 = vmul.f32 0.03125, %v436_v44  ;;  %vm681_vm9 = vmor %vm679_vm5, %vm680_vm7 }
 0x18e   : > { %v712_v59 = vsel %vm711_vm4, %v1190_v6, %v708_v26  ;;  %v1194_v63 = vpop.eup %1193  ;;  %v675_v1 = vmul.f32 %v1192_v24, %v674_v50  ;;  %v536_v6 = vmul.f32 %v1738_v52, %v1738_v52  ;;  %v544_v40 = vmul.f32 %v1749_v8, %v1749_v8 }
 0x18f   : > { %v782_v0 = vmul.f32 %v712_v59, %v590_v48  ;;  %v714_v62 = vmul.f32 %v1194_v63, %v1711_v32  ;;  %v540_v54 = vmul.f32 %v1745_v60, %v1745_v60  ;;  %vm720_vm8 = vweird.f32 %v1194_v63 }
 0x190   : > { %v676_v37 = vmul.f32 0.5, %v675_v1  ;;  %vm721_vm11 = vmor %vm719_vm6, %vm720_vm8  ;;  %v547_v1 = vmul.f32 %v1741_v55, %v1741_v55 }
 0x191   : > { %v1196_v3 = vpop.eup %1195  ;;  %v799_v57 = vmul.f32 %v1636_v12, %v782_v0  ;;  %v715_v61 = vmul.f32 %v1194_v63, %v714_v62  ;;  %v556_v5 = vsub.f32 %v524_v33, %v540_v54 }
 0x192   : > { %v634_v56 = vmul.f32 %v1196_v3, %v1719_v30  ;;  %v492_v7 = vpop.xlane.xlu0 %491  ;;  %v677_v14 = vsub.f32 1.5, %v676_v37  ;;  %vm640_vm10 = vweird.f32 %v1196_v3 }
 0x193   : > { %v816_v13 = vadd.f32 %v1641_v18, %v799_v57  ;;  %v496_v17 = vpop.xlane.xlu2 %495  ;;  %v528_v16 = vmul.f32 0.03125, %v492_v7  ;;  %v716_v20 = vmul.f32 0.5, %v715_v61  ;;  %v572_v22 = vmax.f32 %v556_v5, 0.0  ;;  %vm641_vm13 = vmor %vm639_vm12, %vm640_vm10 }
 0x194   : > { %v635_v21 = vmul.f32 %v1196_v3, %v634_v56  ;;  %v530_v25 = vmul.f32 0.03125, %v496_v17  ;;  %v476_v2 = vpop.xlane.xlu1 %475  ;;  %v678_v19 = vmul.f32 %v1192_v24, %v677_v14 }
 0x195   : > { %832 = vst [vmem:[%s1653_s23 + $0x48] sm:$0xff] %v816_v13  ;;  %v560_v29 = vsub.f32 %v528_v16, %v544_v40  ;;  %v520_v31 = vmul.f32 0.03125, %v476_v2  ;;  %v717_v34 = vsub.f32 1.5, %v716_v20  ;;  %v1767_v27 = vadd.f32 1e-05, %v572_v22 }
 0x196   : > { %v636_v46 = vmul.f32 0.5, %v635_v21  ;;  %v562_v23 = vsub.f32 %v530_v25, %v1728_v28  ;;  %v682_v39 = vsel %vm681_vm9, %v1192_v24, %v678_v19 }
 0x197   : > { %v576_v41 = vmax.f32 %v560_v29, 0.0  ;;  %v552_v47 = vsub.f32 %v520_v31, %v536_v6  ;;  %v779_v53 = vmul.f32 %v682_v39, %v587_v35  ;;  %v718_v26 = vmul.f32 %v1194_v63, %v717_v34 }
 0x198   : > { %v637_v44 = vsub.f32 1.5, %v636_v46  ;;  %1197 = vrsqrt.f32 %v1767_v27  ;;  %v578_v15 = vmax.f32 %v562_v23, 0.0  ;;  %v1779_v35 = vmul.f32 0.03125, %v1722_v43 }
 0x199   : > { %v1775_v48 = vadd.f32 1e-05, %v576_v41  ;;  %v568_v50 = vmax.f32 %v552_v47, 0.0  ;;  %v796_v24 = vmul.f32 %v1636_v12, %v779_v53  ;;  %v722_v28 = vsel %vm721_vm11, %v1194_v63, %v718_v26 }
 0x19a   : > { %v638_v59 = vmul.f32 %v1196_v3, %v637_v44  ;;  %v498_v0 = vpop.xlane.xlu0 %497  ;;  %v783_v32 = vmul.f32 %v722_v28, %v591_v51  ;;  %v1784_v30 = vadd.f32 1e-05, %v578_v15  ;;  %v548_v6 = vmul.f32 %v1779_v35, %v1779_v35 }
 0x19b   : > { %1199 = vrsqrt.f32 %v1775_v48  ;;  %v813_v62 = vadd.f32 %v1641_v18, %v796_v24  ;;  %v1788_v63 = vadd.f32 1e-05, %v568_v50  ;;  %v531_v54 = vmul.f32 0.03125, %v498_v0 }
 0x19c   : > { %v642_v33 = vsel %vm641_vm13, %v1196_v3, %v638_v59  ;;  %v500_v43 = vpop.xlane.xlu1 %499  ;;  %v800_v57 = vmul.f32 %v1636_v12, %v783_v32  ;;  %1201 = vrsqrt.f32 %v1784_v30  ;;  %v588_v23 = vsub.f32 %v1591_v4, %v1745_v60 }
 0x19d   : > { %v775_v51 = vmul.f32 %v642_v33, %v583_v38  ;;  %829 = vst [vmem:[%s1653_s23 + $0x30] sm:$0xff] %v813_v62  ;;  %1203 = vrsqrt.f32 %v1788_v63  ;;  %v563_v3 = vsub.f32 %v531_v54, %v547_v1  ;;  %v532_v61 = vmul.f32 0.03125, %v500_v43 }
 0x19e   : > { %v1198_v37 = vpop.eup %1197  ;;  %v817_v56 = vadd.f32 %v1641_v18, %v800_v57  ;;  %vm689_vm15 = vweird.f32 %v1767_v27  ;;  %v594_v26 = vsub.f32 %v1551_v42, %v1714_v36  ;;  %vm729_vm2 = vweird.f32 %v1775_v48 }
 0x19f   : > { %v792_v5 = vmul.f32 %v1636_v12, %v775_v51  ;;  %v684_v7 = vmul.f32 %v1198_v37, %v1767_v27  ;;  %v579_v45 = vmax.f32 %v563_v3, 0.0  ;;  %v564_v49 = vsub.f32 %v532_v61, %v548_v6 }
 0x1a0   : > { %833 = vst [vmem:[%s1653_s23 + $0x50] sm:$0xff] %v817_v56  ;;  %vm690_vm14 = vweird.f32 %v1198_v37  ;;  %v592_v27 = vsub.f32 %v1604_v11, %v1749_v8  ;;  %vm749_vm6 = vweird.f32 %v1784_v30  ;;  %vm649_vm8 = vweird.f32 %v1788_v63 }
 0x1a1   : > { %v1200_v38 = vpop.eup %1199  ;;  %v809_v13 = vadd.f32 %v1641_v18, %v792_v5  ;;  %v685_v14 = vmul.f32 %v1198_v37, %v684_v7  ;;  %v1805_v17 = vadd.f32 1e-05, %v579_v45  ;;  %v580_v16 = vmax.f32 %v564_v49, 0.0  ;;  %vm691_vm0 = vmor %vm689_vm15, %vm690_vm14 }
 0x1a2   : > { %v724_v40 = vmul.f32 %v1200_v38, %v1775_v48  ;;  %v1202_v20 = vpop.eup %1201  ;;  %vm730_vm1 = vweird.f32 %v1200_v38  ;;  %v584_v11 = vsub.f32 %v1599_v9, %v1738_v52  ;;  %v595_v5 = vsub.f32 %v1577_v58, %v1741_v55 }
 0x1a3   : > { %825 = vst [vmem:[%s1653_s23 + $0x10] sm:$0xff] %v809_v13  ;;  %v686_v21 = vmul.f32 0.5, %v685_v14  ;;  %v1204_v22 = vpop.eup %1203  ;;  %v744_v25 = vmul.f32 %v1202_v20, %v1784_v30  ;;  %1205 = vrsqrt.f32 %v1805_v17  ;;  %v1811_v46 = vadd.f32 1e-05, %v580_v16  ;;  %vm731_vm4 = vmor %vm729_vm2, %vm730_vm1 }
 0x1a4   : > { %v725_v2 = vmul.f32 %v1200_v38, %v724_v40  ;;  %v644_v29 = vmul.f32 %v1204_v22, %v1788_v63  ;;  %vm750_vm3 = vweird.f32 %v1202_v20  ;;  %vm650_vm5 = vweird.f32 %v1204_v22 }
 0x1a5   : > { %v687_v19 = vsub.f32 1.5, %v686_v21  ;;  %v745_v31 = vmul.f32 %v1202_v20, %v744_v25  ;;  %1207 = vrsqrt.f32 %v1811_v46  ;;  %vm751_vm7 = vmor %vm749_vm6, %vm750_vm3  ;;  %vm759_vm11 = vweird.f32 %v1805_v17 }
 0x1a6   : > { %v726_v34 = vmul.f32 0.5, %v725_v2  ;;  %v645_v41 = vmul.f32 %v1204_v22, %v644_v29  ;;  %vm651_vm9 = vmor %vm649_vm8, %vm650_vm5  ;;  %vm769_vm14 = vweird.f32 %v1811_v46  ;;  %v596_v58 = vsub.f32 %v1602_v10, %v1779_v35 }
 0x1a7   : > { %v688_v39 = vmul.f32 %v1198_v37, %v687_v19  ;;  %v746_v47 = vmul.f32 0.5, %v745_v31 }
 0x1a8   : > { %v727_v53 = vsub.f32 1.5, %v726_v34  ;;  %v646_v15 = vmul.f32 0.5, %v645_v41 }
 0x1a9   : > { %v692_v44 = vsel %vm691_vm0, %v1198_v37, %v688_v39  ;;  %v1206_v50 = vpop.eup %1205  ;;  %v747_v4 = vsub.f32 1.5, %v746_v47 }
 0x1aa   : > { %v780_v24 = vmul.f32 %v692_v44, %v588_v23  ;;  %v728_v60 = vmul.f32 %v1200_v38, %v727_v53  ;;  %v647_v28 = vsub.f32 1.5, %v646_v15  ;;  %v754_v59 = vmul.f32 %v1206_v50, %v1805_v17 }
 0x1ab   : > { %v748_v42 = vmul.f32 %v1202_v20, %v747_v4  ;;  %v1208_v62 = vpop.eup %1207  ;;  %vm760_vm10 = vweird.f32 %v1206_v50 }
 0x1ac   : > { %v797_v0 = vmul.f32 %v1636_v12, %v780_v24  ;;  %v732_v36 = vsel %vm731_vm4, %v1200_v38, %v728_v60  ;;  %v648_v1 = vmul.f32 %v1204_v22, %v647_v28  ;;  %v755_v32 = vmul.f32 %v1206_v50, %v754_v59  ;;  %vm761_vm12 = vmor %vm759_vm11, %vm760_vm10 }
 0x1ad   : > { %v784_v48 = vmul.f32 %v732_v36, %v592_v27  ;;  %v752_v33 = vsel %vm751_vm7, %v1202_v20, %v748_v42  ;;  %v764_v63 = vmul.f32 %v1208_v62, %v1811_v46  ;;  %vm770_vm13 = vweird.f32 %v1208_v62 }
 0x1ae   : > { %v814_v8 = vadd.f32 %v1641_v18, %v797_v0  ;;  %v786_v54 = vmul.f32 %v752_v33, %v594_v26  ;;  %v652_v43 = vsel %vm651_vm9, %v1204_v22, %v648_v1  ;;  %v756_v57 = vmul.f32 0.5, %v755_v32  ;;  %vm771_vm15 = vmor %vm769_vm14, %vm770_vm13 }
 0x1af   : > { %v801_v30 = vmul.f32 %v1636_v12, %v784_v48  ;;  %v776_v51 = vmul.f32 %v652_v43, %v584_v11  ;;  %v765_v3 = vmul.f32 %v1208_v62, %v764_v63 }
 0x1b0   : > { %830 = vst [vmem:[%s1653_s23 + $0x38] sm:$0xff] %v814_v8  ;;  %v803_v37 = vmul.f32 %v1636_v12, %v786_v54  ;;  %v757_v52 = vsub.f32 1.5, %v756_v57 }
 0x1b1   : > { %v818_v9 = vadd.f32 %v1641_v18, %v801_v30  ;;  %v793_v6 = vmul.f32 %v1636_v12, %v776_v51  ;;  %v766_v45 = vmul.f32 0.5, %v765_v3 }
 0x1b2   : > { %v820_v61 = vadd.f32 %v1641_v18, %v803_v37  ;;  %v758_v56 = vmul.f32 %v1206_v50, %v757_v52 }
 0x1b3   : > { %834 = vst [vmem:[%s1653_s23 + $0x58] sm:$0xff] %v818_v9  ;;  %v810_v7 = vadd.f32 %v1641_v18, %v793_v6  ;;  %v767_v13 = vsub.f32 1.5, %v766_v45 }
 0x1b4   : > { %836 = vst [vmem:[%s1653_s23 + $0x68] sm:$0xff] %v820_v61  ;;  %v762_v49 = vsel %vm761_vm12, %v1206_v50, %v758_v56 }
 0x1b5   : > { %826 = vst [vmem:[%s1653_s23 + $0x18] sm:$0xff] %v810_v7  ;;  %v787_v38 = vmul.f32 %v762_v49, %v595_v5  ;;  %v768_v40 = vmul.f32 %v1208_v62, %v767_v13 }
 0x1b7   : > { %v804_v14 = vmul.f32 %v1636_v12, %v787_v38  ;;  %v772_v17 = vsel %vm771_vm15, %v1208_v62, %v768_v40 }
 0x1b8   : > { %v788_v16 = vmul.f32 %v772_v17, %v596_v58 }
 0x1b9   : > { %v821_v55 = vadd.f32 %v1641_v18, %v804_v14 }
 0x1ba   : > { %v805_v20 = vmul.f32 %v1636_v12, %v788_v16 }
 0x1bb   : > { %837 = vst [vmem:[%s1653_s23 + $0x70] sm:$0xff] %v821_v55 }
 0x1bc   : > { %v822_v21 = vadd.f32 %v1641_v18, %v805_v20 }
 0x1be   : > { %838 = vst [vmem:[%s1653_s23 + $0x78] sm:$0xff] %v822_v21 }
 0x1bf   : > { %1326 = shalt.err (!%p1323_p10)
}
 0x1c0   : > { %s1375_s11 = smov 128   ;;  %s1376_s25 = smov 8  }
 0x1c1   : > { %1081 = dma.vmem_to_hbm [thread:$0]  (%p1466_p3), %s853_s16, 2048, %s855_s28, %s840_s4, %s1375_s11, %s1375_s11, %s1376_s25  }
 0x1c2 PF: > { %s869_s5 = sand.u32 1, %s1357_s12   ;;  %p1896_p12 = scmp.ge.s32.totalorder %s1369_s15, 2 }
 0x1c3   : > { %s870_s18 = scalar_lea.sflag [#allocation4], %s869_s5 }
 0x1c4   : > { %p1095_p13 = pnand %p1896_p12, %p1432_p6 }
 0x1c6   : > { %p1096_p0 = pneg %p1095_p13 }
 0x1c8   : > { %1352 = dma.done.wait (%p1096_p0), %s870_s18, 2048  }
 0x1c9   : > { %1354 = vsyncadd (%p1096_p0), %s870_s18, 4294965248  ;;  %p17_p5 = scmp.ge.s32.totalorder %s1456_s6, 4   ;;  %s1897_s12 = smov %s1361_s13 }
 0x1ca   : > { %s1898_s13 = smov %s1365_s14  ;;  %s1899_s14 = smov %s1472_s10 }
 0x1cb   : > { %s1900_s15 = smov %s1456_s6  ;;  %19 = sbr.rel (!%p17_p5) target bundleno = 6 (0x6), region = 85 }
 0x1d0   :  { %876 = vsyncpa [#allocation3], 1 }
 0x1d1   :  { %878 = vsyncpa [#allocation3 + $0x1], 1 }
 0x1d2   :  { %879 = vsyncpa [#allocation6], 1 }
 0x1d3   :  { %880 = vsyncpa [#allocation4], 1 }
 0x1d4   :  { %882 = vsyncpa [#allocation4 + $0x1], 1 }

</bundles_post_ra>
